<compile_context>
chip_gen: v7x
topology: tpu7x:2x2x1
jax: 0.10.0
libtpu: 0.0.40
codegen_flags: <defaults>
</compile_context>

<pallas_src>
import functools

import jax
import jax.numpy as jnp
from jax.experimental import pallas as pl
from jax.experimental.pallas import tpu as pltpu


def _round_up(a, b):
    return (a + b - 1) // b * b


def _conv_kernel(x_ref, w_ref, b_ref, o_ref, patch_ref, *,
                 tap_offsets, cin_pad, lout, use_relu):
    """One (batch, row-tile) grid step.

    x_ref    : (cin_pad, lin)          flattened padded input rows (row-major)
    w_ref    : (cout_pad, taps*cin_pad)
    b_ref    : (cout_pad, 1)           float32 bias
    o_ref    : (cout_pad, lout)        lane-dense output slab (already NCHW)
    patch_ref: (taps*cin_pad, lout)    VMEM scratch: im2col patch matrix
    """
    # Build the im2col patch matrix from static lane-offset slices of the
    # single input slab (no HBM duplication of the shifted tap views).
    for t, off in enumerate(tap_offsets):
        patch_ref[t * cin_pad:(t + 1) * cin_pad, :] = x_ref[:, off:off + lout]

    # Single fused contraction over K = taps * cin_pad on the MXU.
    acc = jnp.dot(w_ref[...], patch_ref[...],
                  preferred_element_type=jnp.float32)        # (cout_pad, lout)
    acc = acc + b_ref[...]                                   # f32 epilogue
    if use_relu:
        acc = jnp.maximum(acc, 0.0)
    o_ref[...] = acc.astype(o_ref.dtype)


def conv2d_hwnas_forward(x_nchw, weight, bias, *, padding, use_relu,
                         tile_h=None, compute_dtype=None,
                         vmem_limit_bytes=32 * 1024 * 1024):
    """Conv2DHWNAS.forward: Conv2d(kernel, padding, bias) then optional ReLU."""
    n, cin, h, w = x_nchw.shape
    cout, _, kh, kw = weight.shape
    ho = h + 2 * padding - kh + 1
    wo = w + 2 * padding - kw + 1
    wp = w + 2 * padding                     # = wo + kw - 1

    out_dtype = x_nchw.dtype
    if compute_dtype is None:
        compute_dtype = x_nchw.dtype
    compute_dtype = jnp.dtype(compute_dtype)

    # Channel padding so each tap's patch rows land on packed-sublane
    # boundaries (8 rows * 32 bit): 8 for f32, 16 for bf16.
    pack = 8 * max(1, 4 // compute_dtype.itemsize)
    cin_pad = _round_up(cin, pack)
    cout_pad = _round_up(cout, 8)
    num_taps = kh * kw
    k_total = num_taps * cin_pad

    # ---- choose the output-row tile (bounds per-step VMEM, keeps the DMA
    # pipeline + both v7x TensorCores busy) ----------------------------------
    if tile_h is None:
        # input slab is double-buffered and the patch scratch is ~num_taps x
        # the slab, so keep the slab well under the scoped-VMEM limit.
        budget = max(64 * 1024, vmem_limit_bytes // (4 * (num_taps + 4)))
        wp16 = _round_up(wp, 16)
        rows = budget // (wp16 * cin_pad * compute_dtype.itemsize)
        tile_h = ho if rows >= ho + kh else max(8, ((rows - kh) // 8) * 8)
    tile_h = int(max(1, min(tile_h, ho)))
    num_t = pl.cdiv(ho, tile_h)
    if num_t == 1:
        tile_h, wp_pad = ho, wp
    else:
        tile_h = max(8, (tile_h // 8) * 8)          # sublane-friendly tiles
        num_t = pl.cdiv(ho, tile_h)
        wp_pad = wp if num_t == 1 else _round_up(wp, 16)   # lout % 128 == 0
        if num_t == 1:
            tile_h = ho
    ho_pad = num_t * tile_h
    lin = (tile_h + kh) * wp_pad                    # +1 halo row keeps all tap
    lout = tile_h * wp_pad                          # slices in-bounds

    # ---- single zero-pad of the activation (channels + spatial) ------------
    xp = jnp.pad(
        x_nchw,
        ((0, 0),
         (0, cin_pad - cin),
         (padding, padding + (ho_pad - ho) + 1),
         (padding, padding + (wp_pad - wp))),
    ).astype(compute_dtype)                         # (n, cin_pad, ho_pad+kh, wp_pad)

    if num_t == 1:
        x_tiles = xp.reshape(n, 1, cin_pad, lin)    # no duplication at all
    else:
        # Per-row-tile halo slabs: only the kh-row halo is duplicated (~1.1x),
        # not the 9x of a full im2col.
        x_tiles = jnp.stack(
            [xp[:, :, t * tile_h:t * tile_h + tile_h + kh, :]
             for t in range(num_t)], axis=1,
        ).reshape(n, num_t, cin_pad, lin)

    # ---- weights: (cout, cin, kh, kw) -> (cout_pad, taps*cin_pad) ----------
    w2 = jnp.transpose(weight, (0, 2, 3, 1))                 # (cout, kh, kw, cin)
    w2 = jnp.pad(w2, ((0, cout_pad - cout), (0, 0), (0, 0), (0, cin_pad - cin)))
    w2 = w2.reshape(cout_pad, k_total).astype(compute_dtype)

    if bias is None:
        bias = jnp.zeros((cout,), jnp.float32)
    b2 = jnp.pad(bias.astype(jnp.float32), (0, cout_pad - cout)).reshape(cout_pad, 1)

    tap_offsets = tuple(di * wp_pad + dj for di in range(kh) for dj in range(kw))
    kernel = functools.partial(_conv_kernel, tap_offsets=tap_offsets,
                               cin_pad=cin_pad, lout=lout, use_relu=use_relu)

    itemsize = compute_dtype.itemsize
    cost = pl.CostEstimate(
        flops=2 * n * num_t * cout_pad * k_total * lout,
        transcendentals=0,
        bytes_accessed=(n * num_t * cin_pad * lin * itemsize
                        + cout_pad * k_total * itemsize
                        + cout_pad * 4
                        + n * cout_pad * num_t * lout * jnp.dtype(out_dtype).itemsize),
    )

    out = pl.pallas_call(
        kernel,
        out_shape=jax.ShapeDtypeStruct((n, cout_pad, num_t * lout), out_dtype),
        grid_spec=pltpu.PrefetchScalarGridSpec(
            num_scalar_prefetch=0,
            grid=(n, num_t),
            in_specs=[
                pl.BlockSpec((None, None, cin_pad, lin), lambda b, t: (b, t, 0, 0)),
                pl.BlockSpec((cout_pad, k_total), lambda b, t: (0, 0)),
                pl.BlockSpec((cout_pad, 1), lambda b, t: (0, 0)),
            ],
            out_specs=pl.BlockSpec((None, cout_pad, lout), lambda b, t: (b, 0, t)),
            scratch_shapes=[pltpu.VMEM((k_total, lout), compute_dtype)],
        ),
        compiler_params=pltpu.CompilerParams(
            dimension_semantics=("parallel", "parallel"),
            vmem_limit_bytes=vmem_limit_bytes,
        ),
        cost_estimate=cost,
    )(x_tiles, w2, b2)

    # Output is already NCHW; just drop the channel/row/column padding.
    out = out.reshape(n, cout_pad, ho_pad, wp_pad)[:, :cout, :ho, :wo]
    return out


if __name__ == "__main__":
    # Module config (weight_bits / act_bits only affect the omitted fake-quant).
    weight_bits, act_bits, use_relu = 4, 4, True
    in_channels, out_channels = 4, 8
    in_height = in_width = 16
    kernel_size, padding = 3, 1
    batch = 2

    key = jax.random.PRNGKey(0)
    kx, kw_, kb = jax.random.split(key, 3)

    x = jax.random.normal(
        kx, (batch, in_channels, in_height, in_width), dtype=jnp.float32)
    fan_in = in_channels * kernel_size * kernel_size
    bound = 1.0 / (fan_in ** 0.5)
    weight = jax.random.uniform(
        kw_, (out_channels, in_channels, kernel_size, kernel_size),
        minval=-bound, maxval=bound, dtype=jnp.float32)
    bias = jax.random.uniform(
        kb, (out_channels,), minval=-bound, maxval=bound, dtype=jnp.float32)

    # float32 run (reference-exact path).
    out = conv2d_hwnas_forward(x, weight, bias, padding=padding, use_relu=use_relu)
    out = jax.block_until_ready(out)

    ref = jax.lax.conv_general_dilated(
        x, weight, window_strides=(1, 1),
        padding=((padding, padding), (padding, padding)),
        dimension_numbers=("NCHW", "OIHW", "NCHW"),
    ) + bias[None, :, None, None]
    if use_relu:
        ref = jnp.maximum(ref, 0.0)
    ref = jax.block_until_ready(ref)

    assert out.shape == (batch, out_channels, in_height, in_width)
    assert jnp.allclose(out, ref, atol=1e-4, rtol=1e-4)

    # bfloat16-operand run (v6e-style): bf16 MXU operands, f32 accumulation
    # and f32 bias/ReLU epilogue inside the kernel.
    out_bf = conv2d_hwnas_forward(x, weight, bias, padding=padding,
                                  use_relu=use_relu, compute_dtype=jnp.bfloat16)
    out_bf = jax.block_until_ready(out_bf)
    ref_bf = jax.lax.conv_general_dilated(
        x.astype(jnp.bfloat16), weight.astype(jnp.bfloat16),
        window_strides=(1, 1),
        padding=((padding, padding), (padding, padding)),
        dimension_numbers=("NCHW", "OIHW", "NCHW"),
        preferred_element_type=jnp.float32,
    ) + bias[None, :, None, None]
    if use_relu:
        ref_bf = jnp.maximum(ref_bf, 0.0)
    ref_bf = jax.block_until_ready(ref_bf)
    assert jnp.allclose(out_bf, ref_bf.astype(out_bf.dtype), atol=1e-3, rtol=1e-3)

    print("KERNEL_OK")
</pallas_src>

<mosaic_0001>
module attributes {stable_mosaic.version = 11 : i64} {
  func.func @_conv_kernel(%arg0: i32, %arg1: i32, %arg2: memref<1x1x8x342xf32, #tpu.memory_space<vmem>>, %arg3: memref<8x72xf32, #tpu.memory_space<vmem>>, %arg4: memref<8x1xf32, #tpu.memory_space<vmem>>, %arg5: memref<1x8x288xf32, #tpu.memory_space<vmem>>, %arg6: memref<72x288xf32, #tpu.memory_space<vmem>>) attributes {dimension_semantics = [#tpu.dimension_semantics<parallel>, #tpu.dimension_semantics<parallel>], iteration_bounds = array<i64: 2, 1>, scalar_prefetch = 0 : i64, scratch_operands = 1 : i64, tpu.core_type = #tpu.core_type<tc>, window_params = [{transform_indices = @transform_0, window_bounds = array<i64: 1, 1, 8, 342>}, {pipeline_mode = #tpu.pipeline_mode<synchronous>, transform_indices = @transform_1, window_bounds = array<i64: 8, 72>}, {pipeline_mode = #tpu.pipeline_mode<synchronous>, transform_indices = @transform_2, window_bounds = array<i64: 8, 1>}, {transform_indices = @transform_3, window_bounds = array<i64: 1, 8, 288>}]} {
    %c0 = arith.constant 0 : index
    %c0_0 = arith.constant 0 : index
    %c0_1 = arith.constant 0 : index
    %c0_2 = arith.constant 0 : index
    %0 = vector.load %arg2[%c0, %c0_0, %c0_1, %c0_2] : memref<1x1x8x342xf32, #tpu.memory_space<vmem>>, vector<1x1x8x288xf32>
    %1 = vector.shape_cast %0 : vector<1x1x8x288xf32> to vector<8x288xf32>
    %c0_3 = arith.constant 0 : index
    %c0_4 = arith.constant 0 : index
    %2 = vector.load %arg6[%c0_3, %c0_4] : memref<72x288xf32, #tpu.memory_space<vmem>>, vector<8x288xf32>
    tpu.vector_store %arg6[%c0_3, %c0_4], %1 {strides = array<i32>} : memref<72x288xf32, #tpu.memory_space<vmem>>, vector<8x288xf32>,
    %c0_5 = arith.constant 0 : index
    %c0_6 = arith.constant 0 : index
    %c0_7 = arith.constant 0 : index
    %c1 = arith.constant 1 : index
    %3 = vector.load %arg2[%c0_5, %c0_6, %c0_7, %c1] : memref<1x1x8x342xf32, #tpu.memory_space<vmem>>, vector<1x1x8x288xf32>
    %4 = vector.shape_cast %3 : vector<1x1x8x288xf32> to vector<8x288xf32>
    %c8 = arith.constant 8 : index
    %c0_8 = arith.constant 0 : index
    %5 = vector.load %arg6[%c8, %c0_8] : memref<72x288xf32, #tpu.memory_space<vmem>>, vector<8x288xf32>
    tpu.vector_store %arg6[%c8, %c0_8], %4 {strides = array<i32>} : memref<72x288xf32, #tpu.memory_space<vmem>>, vector<8x288xf32>,
    %c0_9 = arith.constant 0 : index
    %c0_10 = arith.constant 0 : index
    %c0_11 = arith.constant 0 : index
    %c2 = arith.constant 2 : index
    %6 = vector.load %arg2[%c0_9, %c0_10, %c0_11, %c2] : memref<1x1x8x342xf32, #tpu.memory_space<vmem>>, vector<1x1x8x288xf32>
    %7 = vector.shape_cast %6 : vector<1x1x8x288xf32> to vector<8x288xf32>
    %c16 = arith.constant 16 : index
    %c0_12 = arith.constant 0 : index
    %8 = vector.load %arg6[%c16, %c0_12] : memref<72x288xf32, #tpu.memory_space<vmem>>, vector<8x288xf32>
    tpu.vector_store %arg6[%c16, %c0_12], %7 {strides = array<i32>} : memref<72x288xf32, #tpu.memory_space<vmem>>, vector<8x288xf32>,
    %c0_13 = arith.constant 0 : index
    %c0_14 = arith.constant 0 : index
    %c0_15 = arith.constant 0 : index
    %c18 = arith.constant 18 : index
    %9 = vector.load %arg2[%c0_13, %c0_14, %c0_15, %c18] : memref<1x1x8x342xf32, #tpu.memory_space<vmem>>, vector<1x1x8x288xf32>
    %10 = vector.shape_cast %9 : vector<1x1x8x288xf32> to vector<8x288xf32>
    %c24 = arith.constant 24 : index
    %c0_16 = arith.constant 0 : index
    %11 = vector.load %arg6[%c24, %c0_16] : memref<72x288xf32, #tpu.memory_space<vmem>>, vector<8x288xf32>
    tpu.vector_store %arg6[%c24, %c0_16], %10 {strides = array<i32>} : memref<72x288xf32, #tpu.memory_space<vmem>>, vector<8x288xf32>,
    %c0_17 = arith.constant 0 : index
    %c0_18 = arith.constant 0 : index
    %c0_19 = arith.constant 0 : index
    %c19 = arith.constant 19 : index
    %12 = vector.load %arg2[%c0_17, %c0_18, %c0_19, %c19] : memref<1x1x8x342xf32, #tpu.memory_space<vmem>>, vector<1x1x8x288xf32>
    %13 = vector.shape_cast %12 : vector<1x1x8x288xf32> to vector<8x288xf32>
    %c32 = arith.constant 32 : index
    %c0_20 = arith.constant 0 : index
    %14 = vector.load %arg6[%c32, %c0_20] : memref<72x288xf32, #tpu.memory_space<vmem>>, vector<8x288xf32>
    tpu.vector_store %arg6[%c32, %c0_20], %13 {strides = array<i32>} : memref<72x288xf32, #tpu.memory_space<vmem>>, vector<8x288xf32>,
    %c0_21 = arith.constant 0 : index
    %c0_22 = arith.constant 0 : index
    %c0_23 = arith.constant 0 : index
    %c20 = arith.constant 20 : index
    %15 = vector.load %arg2[%c0_21, %c0_22, %c0_23, %c20] : memref<1x1x8x342xf32, #tpu.memory_space<vmem>>, vector<1x1x8x288xf32>
    %16 = vector.shape_cast %15 : vector<1x1x8x288xf32> to vector<8x288xf32>
    %c40 = arith.constant 40 : index
    %c0_24 = arith.constant 0 : index
    %17 = vector.load %arg6[%c40, %c0_24] : memref<72x288xf32, #tpu.memory_space<vmem>>, vector<8x288xf32>
    tpu.vector_store %arg6[%c40, %c0_24], %16 {strides = array<i32>} : memref<72x288xf32, #tpu.memory_space<vmem>>, vector<8x288xf32>,
    %c0_25 = arith.constant 0 : index
    %c0_26 = arith.constant 0 : index
    %c0_27 = arith.constant 0 : index
    %c36 = arith.constant 36 : index
    %18 = vector.load %arg2[%c0_25, %c0_26, %c0_27, %c36] : memref<1x1x8x342xf32, #tpu.memory_space<vmem>>, vector<1x1x8x288xf32>
    %19 = vector.shape_cast %18 : vector<1x1x8x288xf32> to vector<8x288xf32>
    %c48 = arith.constant 48 : index
    %c0_28 = arith.constant 0 : index
    %20 = vector.load %arg6[%c48, %c0_28] : memref<72x288xf32, #tpu.memory_space<vmem>>, vector<8x288xf32>
    tpu.vector_store %arg6[%c48, %c0_28], %19 {strides = array<i32>} : memref<72x288xf32, #tpu.memory_space<vmem>>, vector<8x288xf32>,
    %c0_29 = arith.constant 0 : index
    %c0_30 = arith.constant 0 : index
    %c0_31 = arith.constant 0 : index
    %c37 = arith.constant 37 : index
    %21 = vector.load %arg2[%c0_29, %c0_30, %c0_31, %c37] : memref<1x1x8x342xf32, #tpu.memory_space<vmem>>, vector<1x1x8x288xf32>
    %22 = vector.shape_cast %21 : vector<1x1x8x288xf32> to vector<8x288xf32>
    %c56 = arith.constant 56 : index
    %c0_32 = arith.constant 0 : index
    %23 = vector.load %arg6[%c56, %c0_32] : memref<72x288xf32, #tpu.memory_space<vmem>>, vector<8x288xf32>
    tpu.vector_store %arg6[%c56, %c0_32], %22 {strides = array<i32>} : memref<72x288xf32, #tpu.memory_space<vmem>>, vector<8x288xf32>,
    %c0_33 = arith.constant 0 : index
    %c0_34 = arith.constant 0 : index
    %c0_35 = arith.constant 0 : index
    %c38 = arith.constant 38 : index
    %24 = vector.load %arg2[%c0_33, %c0_34, %c0_35, %c38] : memref<1x1x8x342xf32, #tpu.memory_space<vmem>>, vector<1x1x8x288xf32>
    %25 = vector.shape_cast %24 : vector<1x1x8x288xf32> to vector<8x288xf32>
    %c64 = arith.constant 64 : index
    %c0_36 = arith.constant 0 : index
    %26 = vector.load %arg6[%c64, %c0_36] : memref<72x288xf32, #tpu.memory_space<vmem>>, vector<8x288xf32>
    tpu.vector_store %arg6[%c64, %c0_36], %25 {strides = array<i32>} : memref<72x288xf32, #tpu.memory_space<vmem>>, vector<8x288xf32>,
    %c0_37 = arith.constant 0 : index
    %c0_38 = arith.constant 0 : index
    %27 = vector.load %arg3[%c0_37, %c0_38] : memref<8x72xf32, #tpu.memory_space<vmem>>, vector<8x72xf32>
    %c0_39 = arith.constant 0 : index
    %c0_40 = arith.constant 0 : index
    %28 = vector.load %arg6[%c0_39, %c0_40] : memref<72x288xf32, #tpu.memory_space<vmem>>, vector<72x288xf32>
    %cst = arith.constant dense<0.000000e+00> : vector<8x288xf32>
    %29 = tpu.matmul %27, %28, %cst {dimension_numbers = #tpu.dot_dimension_numbers<[1], [0], [0], [1], [0, 0, 1, 1], [], []>} : vector<8x72xf32>, vector<72x288xf32>, vector<8x288xf32> -> vector<8x288xf32>
    %c0_41 = arith.constant 0 : index
    %c0_42 = arith.constant 0 : index
    %30 = vector.load %arg4[%c0_41, %c0_42] : memref<8x1xf32, #tpu.memory_space<vmem>>, vector<8x1xf32>
    %31 = vector.broadcast %30 : vector<8x1xf32> to vector<8x288xf32>
    %32 = arith.addf %29, %31 : vector<8x288xf32>
    %cst_43 = arith.constant 0.000000e+00 : f32
    %33 = vector.broadcast %cst_43 : f32 to vector<8x288xf32>
    %34 = arith.maximumf %32, %33 : vector<8x288xf32>
    %c0_44 = arith.constant 0 : index
    %c0_45 = arith.constant 0 : index
    %c0_46 = arith.constant 0 : index
    %35 = vector.load %arg5[%c0_44, %c0_45, %c0_46] : memref<1x8x288xf32, #tpu.memory_space<vmem>>, vector<1x8x288xf32>
    %36 = vector.shape_cast %35 : vector<1x8x288xf32> to vector<8x288xf32>
    %37 = vector.shape_cast %34 : vector<8x288xf32> to vector<1x8x288xf32>
    tpu.vector_store %arg5[%c0_44, %c0_45, %c0_46], %37 {strides = array<i32>} : memref<1x8x288xf32, #tpu.memory_space<vmem>>, vector<1x8x288xf32>,
    return
  }
  func.func @transform_0(%arg0: i32, %arg1: i32) -> (i32, i32, i32, i32) {
    %c0_i32 = arith.constant 0 : i32
    %c0_i32_0 = arith.constant 0 : i32
    %c0_i32_1 = arith.constant 0 : i32
    return %arg0, %arg1, %c0_i32, %c0_i32_0 : i32, i32, i32, i32
  }
  func.func @transform_1(%arg0: i32, %arg1: i32) -> (i32, i32) {
    %c0_i32 = arith.constant 0 : i32
    %c0_i32_0 = arith.constant 0 : i32
    %c0_i32_1 = arith.constant 0 : i32
    return %c0_i32, %c0_i32_0 : i32, i32
  }
  func.func @transform_2(%arg0: i32, %arg1: i32) -> (i32, i32) {
    %c0_i32 = arith.constant 0 : i32
    %c0_i32_0 = arith.constant 0 : i32
    %c0_i32_1 = arith.constant 0 : i32
    return %c0_i32, %c0_i32_0 : i32, i32
  }
  func.func @transform_3(%arg0: i32, %arg1: i32) -> (i32, i32, i32) {
    %c0_i32 = arith.constant 0 : i32
    %c0_i32_0 = arith.constant 0 : i32
    return %arg0, %c0_i32, %arg1 : i32, i32, i32
  }
}

</mosaic_0001>

<bundles_post_ra>
// kernel: tpu_custom_call.1
= control target key start
LH: loop header
LB: loop body
LE: loop exit
PB: predicated region body
PF: predicated region fallthrough
CT: control target
= control target key end

     0   :  { %8 = vsyncpa [#allocation4], 0  ;;  %s1167_s0 = inlined_call_operand.hbm [shape: f32[2,1,8,342], index: 0, kind: input, shape index: {}]   ;;  %s1168_s1 = inlined_call_operand.vmem [shape: f32[8,72], index: 1, kind: input, shape index: {}]   ;;  %s1169_s2 = inlined_call_operand.vmem [shape: f32[8,1], index: 2, kind: input, shape index: {}]   ;;  %s1170_s3 = inlined_call_operand.hbm [shape: f32[2,8,288], index: 3, kind: output, shape index: {}]  }
   0x1   :  { %10 = vsyncpa [#allocation4 + $0x1], 0 }
   0x2   :  { %11 = vsyncpa [#allocation5], 0 }
   0x3   :  { %13 = vsyncpa [#allocation5 + $0x1], 0  ;;  %s964_s12 = smov 0   ;;  %s966_s13 = smov 0  }
   0x4   :  { %s968_s14 = smov 0   ;;  %s970_s15 = smov 0  }
   0x5   :  { %s972_s16 = smov 0   ;;  %s974_s17 = smov 0  }
   0x6 LB: > { %s667_s18 = sadd.s32 4294967295, %s928_s17   ;;  %s668_s19 = sadd.s32 4294967294, %s928_s17   ;;  %s928_s17 = sphi %s974_s17, %s19_s17   ;;  %s924_s16 = sphi %s972_s16, %s1185_s16   ;;  %s920_s15 = sphi %s970_s15, %s1184_s15   ;;  %s916_s14 = sphi %s968_s14, %s1183_s14   ;;  %s912_s13 = sphi %s966_s13, %s1182_s13   ;;  %s908_s12 = sphi %s964_s12, %s1181_s12  }
   0x7   : > { %s31_s20 = sadd.s32 1, %s924_s16  ;;  %s40_s21 = sadd.s32 1, %s916_s14 }
   0x8   : > { %p33_p0 = scmp.ge.s32.totalorder %s31_s20, 2  ;;  %p47_p1 = scmp.ne.s32.totalorder %s916_s14, %s912_s13 }
   0x9   : > { %p48_p2 = scmp.eq.s32.totalorder %s928_s17, 0  ;;  %p53_p3 = scmp.ne.s32.totalorder %s912_s13, %s908_s12 }
   0xa   : > { %s1187_s20 = smov (%p33_p0, %s31_s20), 0  ;;  %p54_p5 = scmp.eq.s32.totalorder %s667_s18, 0 }
   0xb   : > { %p1005_p4 = por %p48_p2, %p47_p1  ;;  %s35_s23 = ssub.s32 %s924_s16, %s1187_s20 }
   0xc   : > { %p121_p6 = scmp.eq.s32.totalorder %s667_s18, 1  ;;  %p38_p7 = scmp.eq.s32.totalorder %s35_s23, 0 }
   0xd   : > { %p1011_p8 = por %p54_p5, %p53_p3  ;;  %p127_p10 = scmp.eq.s32.totalorder %s668_s19, 1 }
   0xe   : > { %p1015_p9 = por %p121_p6, %p47_p1  ;;  %p753_p13 = scmp.lt.s32.totalorder %s928_s17, 2 }
   0xf   : > { %s1020_s26 = scalar_select %p38_p7, %s916_s14, %s40_s21  }
  0x10   : > { %s1174_s25 = scalar_select %p1015_p9, 1, 0 }
  0x11   : > { %p1022_p11 = por %p127_p10, %p53_p3  ;;  %s153_s28 = sand.u32 1, %s916_s14  }
  0x12   : > { %s737_s29 = smul.u32 24, %s153_s28  ;;  %p1032_p0 = pnand %p753_p13, %p1005_p4 }
  0x13   : > { %s1175_s27 = scalar_select %p1022_p11, 1, 0 }
  0x14   : > { %s738_s30 = smul.u32 384, %s924_s16  ;;  %s157_s8 = scalar_lea.vmem [#allocation3], %s737_s29 }
  0x15   : > { %s167_s9 = sshll.u32 %s157_s8, 4  ;;  %s154_s10 = scalar_lea.sflag [#allocation4], %s153_s28  ;;  %s1042_s9 = int_to_ptr.vmem [resolvable:$true] %s167_s9 }
  0x16   : > { %s1040_s7 = scalar_lea.hbm %s1167_s0, %s738_s30  ;;  %p818_p3 = pneg %p1032_p0 }
  0x17   : > { %s816_s11 = scalar_lea.hbm %s1040_s7, 384  ;;  %s821_s21 = scalar_lea.hbm %s1167_s0, 768 }
  0x18   : > { %p817_p2 = scmp.ne.s32.totalorder %s1040_s7, %s816_s11  ;;  %p822_p6 = scmp.lt.u32.totalorder %s1040_s7, %s1167_s0 }
  0x19   : > { %p823_p7 = scmp.lt.u32.totalorder %s821_s21, %s816_s11  ;;  %p825_p13 = scmp.lt.u32.totalorder %s816_s11, %s1040_s7 }
  0x1a   : > { %p819_p4 = pnand %p818_p3, %p817_p2 }
  0x1b   : > { %p824_p10 = por %p823_p7, %p822_p6 }
  0x1c   : > { %p820_p5 = pneg %p819_p4 }
  0x1d   : > { %p826_p12 = por %p825_p13, %p824_p10 }
  0x1f   : > { %p827_p1 = pnand %p826_p12, %p820_p5 }
  0x21   : > { %830 = shalt.err (!%p827_p1)
}
  0x22   : > { %s831_s28 = scalar_lea.vmem %s1042_s9, 384  ;;  %s930_s29 = smov [#allocation3]  }
  0x23   : > { %p832_p2 = scmp.ne.s32.totalorder %s1042_s9, %s831_s28  ;;  %s836_s30 = sshll.u32 %s930_s29, 4  ;;  %s837_s30 = int_to_ptr.vmem [resolvable:$false] %s836_s30 }
  0x24   : > { %s838_s5 = scalar_lea.vmem %s837_s30, 768  ;;  %p839_p9 = scmp.lt.s32.totalorder %s1042_s9, %s837_s30 }
  0x25   : > { %p834_p4 = pnand %p832_p2, %p818_p3  ;;  %p840_p6 = scmp.lt.s32.totalorder %s838_s5, %s831_s28 }
  0x27   : > { %p835_p11 = pneg %p834_p4  ;;  %p841_p7 = por %p840_p6, %p839_p9 }
  0x29   : > { %p842_p10 = pnand %p841_p7, %p835_p11 }
  0x2b   : > { %845 = shalt.err (!%p842_p10)
}
  0x2c   : > { %748 = dma.hbm_to_vmem [thread:$0]  (!%p1032_p0), %s1040_s7, 384, %s1042_s9, %s154_s10  }
  0x2d   : > { %p172_p12 = scmp.lt.s32.totalorder %s928_s17, 3  ;;  %p1177_p1 = scmp.ge.s32.totalorder %s928_s17, 1 }
  0x2f   : > { %p173_p3 = pnand %p1177_p1, %p172_p12 }
  0x30   : > { %s1073_s6 = sand.u32 (!%p173_p3), 1, %s912_s13  }
  0x31   : > { %176 = sbr.rel (%p173_p3) target bundleno = 456 (0x1c8), region = 32  ;;  %s179_s11 = scalar_lea.sflag (!%p173_p3), [#allocation4], %s1073_s6 }
  0x32   : > { %s739_s8 = smul.u32 (!%p173_p3), 24, %s1073_s6 }
  0x34   : > { %s182_s4 = scalar_lea.vmem (!%p173_p3), [#allocation3], %s739_s8 }
  0x38   : > { %899 = dma.done.wait (%p1011_p8), %s179_s11, 384  }
  0x39   : > { %901 = vsyncadd (%p1011_p8), %s179_s11, 4294966912  ;;  %vm211_vm0 = vcmask 261120   ;;  %v214_v0 = vld [vmem:[%s182_s4 + $0x8] sm:$0xff]  ;;  %v213_v1 = vld [vmem:[%s182_s4] sm:$0xff]  ;;  %s931_s7 = smov 127   ;;  %v932_v3 = vmov 0.0|0.0  }
  0x3a   : > { %v215_v2 = vld [vmem:[%s182_s4 + $0x10] sm:$0xff]  ;;  %221 = vrot.lane.b32.xlu0 %v214_v0, %s931_s7  ;;  %219 = vrot.lane.b32.xlu1 %v213_v1, %s931_s7  ;;  %s933_s9 = smov 126   ;;  %s934_s10 = smov 110   ;;  %v939_v4 = vmov 0.0   ;;  %vm940_vm1 = vmmov 0   ;;  %v942_v5 = vmov 0  }
  0x3b   : > { %212 = vst.msk [vmem:[#allocation2 + $0x10] sm:$0xff] %vm211_vm0, %v215_v2  ;;  %725 = vmatprep.subr.bf16.mxu1 %v932_v3  ;;  %s935_s24 = smov 109   ;;  %s936_s18 = smov 108   ;;  %483 = vmatprep.mubr.f32.mxu0 %v939_v4  ;;  %v409_v6 = vld [vmem:[%s1169_s2] sm:$0xff]  ;;  %vm225_vm2 = vcmask 1039360   ;;  %vm246_vm3 = vcmask 1031168  }
  0x3c   : > { %s937_s19 = smov 92   ;;  %s938_s21 = smov 91   ;;  %706 = vmatprep.mubr.msk.f32.mxu1 %vm940_vm1, %v939_v4  ;;  %815 = vset.pattern.permute.xlu0 %v942_v5  ;;  %vm267_vm4 = vcmask 900096   ;;  %vm288_vm5 = vcmask 891904   ;;  %vm309_vm6 = vcmask 883712   ;;  %vm330_vm7 = vcmask 752640  }
  0x3d   : > { %s941_s22 = smov 90   ;;  %vm351_vm8 = vcmask 744448   ;;  %vm372_vm9 = vcmask 736256   ;;  %vm415_vm10 = vcmask 588800   ;;  %s740_s5 = smul.u32 384, %s920_s15 }
  0x3e   : > { %223 = vrot.lane.b32.xlu0 %v215_v2, %s931_s7  ;;  %242 = vrot.lane.b32.xlu1 %v214_v0, %s933_s9  ;;  %s204_s11 = scalar_lea.vmem [#allocation6], %s739_s8  ;;  %s567_s15 = scalar_lea.sflag [#allocation5], %s1073_s6 }
  0x3f   : > { %s583_s4 = sshll.u32 %s204_s11, 4  ;;  %p1178_p9 = scmp.ne.s32.totalorder %s1174_s25, 0  ;;  %s1119_s4 = int_to_ptr.vmem [resolvable:$true] %s583_s4 }
  0x40   : > { %s846_s8 = scalar_lea.vmem %s1119_s4, 384 }
  0x41   : > { %p847_p8 = scmp.ne.s32.totalorder %s1119_s4, %s846_s8 }
  0x42   : > { %244 = vrot.lane.b32.xlu0 %v215_v2, %s933_s9  ;;  %263 = vrot.lane.b32.xlu1 %v214_v0, %s934_s10  ;;  %v384_v18 = vld [vmem:[#allocation2 + $0x10] sm:$0xff] }
  0x43   : > { %p848_p11 = pnand %p847_p8, %p1178_p9 }
  0x45   : > { %p849_p0 = pneg %p848_p11 }
  0x46   : > { %265 = vrot.lane.b32.xlu0 %v215_v2, %s934_s10  ;;  %240 = vrot.lane.b32.xlu1 %v213_v1, %s933_s9 }
  0x4a   : > { %261 = vrot.lane.b32.xlu0 %v213_v1, %s934_s10  ;;  %284 = vrot.lane.b32.xlu1 %v214_v0, %s935_s24  ;;  %s1117_s10 = scalar_lea.hbm %s1170_s3, %s740_s5 }
  0x4e   : > { %286 = vrot.lane.b32.xlu0 %v215_v2, %s935_s24  ;;  %305 = vrot.lane.b32.xlu1 %v214_v0, %s936_s18 }
  0x52   : > { %307 = vrot.lane.b32.xlu0 %v215_v2, %s936_s18  ;;  %282 = vrot.lane.b32.xlu1 %v213_v1, %s935_s24  ;;  %s943_s24 = smov [#allocation6]  }
  0x56   : > { %303 = vrot.lane.b32.xlu0 %v213_v1, %s936_s18  ;;  %326 = vrot.lane.b32.xlu1 %v214_v0, %s937_s19  ;;  %s850_s18 = sshll.u32 %s943_s24, 4  ;;  %s851_s18 = int_to_ptr.vmem [resolvable:$false] %s850_s18 }
  0x57   : > { %p853_p5 = scmp.lt.s32.totalorder %s1119_s4, %s851_s18 }
  0x5a   : > { %328 = vrot.lane.b32.xlu0 %v215_v2, %s937_s19  ;;  %347 = vrot.lane.b32.xlu1 %v214_v0, %s938_s21 }
  0x5e   : > { %349 = vrot.lane.b32.xlu0 %v215_v2, %s938_s21  ;;  %324 = vrot.lane.b32.xlu1 %v213_v1, %s937_s19  ;;  %s852_s19 = scalar_lea.vmem %s851_s18, 768 }
  0x5f   : > { %p854_p13 = scmp.lt.s32.totalorder %s852_s19, %s846_s8 }
  0x61   : > { %p855_p2 = por %p854_p13, %p853_p5 }
  0x62   : > { %345 = vrot.lane.b32.xlu0 %v213_v1, %s938_s21  ;;  %368 = vrot.lane.b32.xlu1 %v214_v0, %s941_s22 }
  0x63   : > { %p856_p4 = pnand %p855_p2, %p849_p0 }
  0x66   : > { %370 = vrot.lane.b32.xlu0 %v215_v2, %s941_s22  ;;  %366 = vrot.lane.b32.xlu1 %v213_v1, %s941_s22 }
  0x6a   : > { %412 = vperm.xlu0 %815, %v409_v6  }
  0xac   : > { %v222_v7 = vpop.permute.xlu0 %221  ;;  %v220_v8 = vpop.permute.xlu1 %219 }
  0xad   : > { %v226_v9 = vsel %vm225_vm2, %v220_v8, %v222_v7 }
  0xae   : > { %v711_v14 = vpack.c.bf16 %v226_v9, %v213_v1 }
  0xb0   : > { %v224_v10 = vpop.permute.xlu0 %223  ;;  %v243_v11 = vpop.permute.xlu1 %242 }
  0xb1   : > { %v227_v12 = vsel %vm225_vm2, %v222_v7, %v224_v10  ;;  %233 = vst.msk [vmem:[#allocation2 + $0x28] sm:$0xff] %vm211_vm0, %v224_v10 }
  0xb2   : > { %v709_v13 = vpack.c.bf16 %v227_v12, %v214_v0 }
  0xb4   : > { %v245_v15 = vpop.permute.xlu0 %244  ;;  %v264_v16 = vpop.permute.xlu1 %263  ;;  %710 = vmatprep.subr.bf16.mxu0 %v709_v13 }
  0xb5   : > { %v248_v17 = vsel %vm246_vm3, %v243_v11, %v245_v15  ;;  %254 = vst.msk [vmem:[#allocation2 + $0x40] sm:$0xff] %vm211_vm0, %v245_v15  ;;  %712 = vmatpush1.bf16.msra.mxu0 %v711_v14 }
  0xb8   : > { %v266_v19 = vpop.permute.xlu0 %265  ;;  %v241_v20 = vpop.permute.xlu1 %240  ;;  %v387_v21 = vld [vmem:[#allocation2 + $0x28] sm:$0xff] }
  0xb9   : > { %v269_v22 = vsel %vm267_vm4, %v264_v16, %v266_v19  ;;  %275 = vst.msk [vmem:[#allocation2 + $0x58] sm:$0xff] %vm211_vm0, %v266_v19  ;;  %v247_v23 = vsel %vm246_vm3, %v241_v20, %v243_v11  ;;  %v726_v24 = vpack.c.bf16 %v387_v21, %v384_v18 }
  0xba   : > { %v713_v25 = vpack.c.bf16 %v269_v22, %v248_v17 }
  0xbb   : > { %727 = vmatpush3.bf16.msra.mxu1 %v726_v24 }
  0xbc   : > { %v262_v26 = vpop.permute.xlu0 %261  ;;  %v285_v27 = vpop.permute.xlu1 %284  ;;  %728 = vmatprep.subr.bf16.mxu1 %v932_v3  ;;  %714 = vmatprep.subr.bf16.mxu0 %v713_v25  ;;  %v390_v32 = vld [vmem:[#allocation2 + $0x40] sm:$0xff] }
  0xbd   : > { %v268_v28 = vsel %vm267_vm4, %v262_v26, %v264_v16 }
  0xbe   : > { %v715_v29 = vpack.c.bf16 %v268_v28, %v247_v23 }
  0xc0   : > { %v287_v30 = vpop.permute.xlu0 %286  ;;  %v306_v31 = vpop.permute.xlu1 %305  ;;  %v393_v33 = vld [vmem:[#allocation2 + $0x58] sm:$0xff]  ;;  %716 = vmatpush1.bf16.msra.mxu0 %v715_v29 }
  0xc1   : > { %v290_v34 = vsel %vm288_vm5, %v285_v27, %v287_v30  ;;  %296 = vst.msk [vmem:[#allocation2 + $0x70] sm:$0xff] %vm211_vm0, %v287_v30  ;;  %v729_v35 = vpack.c.bf16 %v393_v33, %v390_v32 }
  0xc3   : > { %730 = vmatpush3.bf16.msra.mxu1 %v729_v35 }
  0xc4   : > { %v308_v36 = vpop.permute.xlu0 %307  ;;  %v283_v37 = vpop.permute.xlu1 %282  ;;  %731 = vmatprep.subr.bf16.mxu1 %v932_v3 }
  0xc5   : > { %v311_v38 = vsel %vm309_vm6, %v306_v31, %v308_v36  ;;  %317 = vst.msk [vmem:[#allocation2 + $0x88] sm:$0xff] %vm211_vm0, %v308_v36  ;;  %v289_v39 = vsel %vm288_vm5, %v283_v37, %v285_v27 }
  0xc6   : > { %v717_v40 = vpack.c.bf16 %v311_v38, %v290_v34 }
  0xc8   : > { %v304_v41 = vpop.permute.xlu0 %303  ;;  %v327_v42 = vpop.permute.xlu1 %326  ;;  %718 = vmatprep.subr.bf16.mxu0 %v717_v40  ;;  %v396_v47 = vld [vmem:[#allocation2 + $0x70] sm:$0xff] }
  0xc9   : > { %v310_v43 = vsel %vm309_vm6, %v304_v41, %v306_v31 }
  0xca   : > { %v719_v44 = vpack.c.bf16 %v310_v43, %v289_v39 }
  0xcc   : > { %v329_v45 = vpop.permute.xlu0 %328  ;;  %v348_v46 = vpop.permute.xlu1 %347  ;;  %v399_v48 = vld [vmem:[#allocation2 + $0x88] sm:$0xff]  ;;  %720 = vmatpush1.bf16.msra.mxu0 %v719_v44 }
  0xcd   : > { %v332_v49 = vsel %vm330_vm7, %v327_v42, %v329_v45  ;;  %338 = vst.msk [vmem:[#allocation2 + $0xa0] sm:$0xff] %vm211_vm0, %v329_v45  ;;  %v732_v50 = vpack.c.bf16 %v399_v48, %v396_v47 }
  0xcf   : > { %733 = vmatpush3.bf16.msra.mxu1 %v732_v50 }
  0xd0   : > { %v350_v51 = vpop.permute.xlu0 %349  ;;  %v325_v52 = vpop.permute.xlu1 %324  ;;  %734 = vmatprep.subr.bf16.mxu1 %v932_v3  ;;  %v381_v3 = vld [vmem:[%s1168_s1] sm:$0xff] }
  0xd1   : > { %v353_v53 = vsel %vm351_vm8, %v348_v46, %v350_v51  ;;  %359 = vst.msk [vmem:[#allocation2 + $0xb8] sm:$0xff] %vm211_vm0, %v350_v51  ;;  %v331_v54 = vsel %vm330_vm7, %v325_v52, %v327_v42 }
  0xd2   : > { %v721_v55 = vpack.c.bf16 %v353_v53, %v332_v49 }
  0xd4   : > { %v346_v56 = vpop.permute.xlu0 %345  ;;  %v369_v57 = vpop.permute.xlu1 %368  ;;  %722 = vmatprep.subr.bf16.mxu0 %v721_v55  ;;  %v402_v62 = vld [vmem:[#allocation2 + $0xa0] sm:$0xff] }
  0xd5   : > { %v352_v58 = vsel %vm351_vm8, %v346_v56, %v348_v46 }
  0xd6   : > { %v723_v59 = vpack.c.bf16 %v352_v58, %v331_v54 }
  0xd8   : > { %v371_v60 = vpop.permute.xlu0 %370  ;;  %v367_v61 = vpop.permute.xlu1 %366  ;;  %v405_v63 = vld [vmem:[#allocation2 + $0xb8] sm:$0xff]  ;;  %724 = vmatpush1.bf16.msra.mxu0 %v723_v59 }
  0xd9   : > { %v374_v0 = vsel %vm372_vm9, %v369_v57, %v371_v60  ;;  %380 = vst.msk [vmem:[#allocation2 + $0xd0] sm:$0xff] %vm211_vm0, %v371_v60  ;;  %v373_v1 = vsel %vm372_vm9, %v367_v61, %v369_v57  ;;  %v735_v2 = vpack.c.bf16 %v405_v63, %v402_v62 }
  0xda   : > { %435 = vmatprep.subr.mxu0 %v374_v0 }
  0xdb   : > { %736 = vmatpush3.bf16.msra.mxu1 %v735_v2 }
  0xdc   : > { %704 = vmatprep.subr.mxu1 %v939_v4  ;;  %436 = vmatpush1.msra.mxu0 %v373_v1 }
  0xdd   : > { %673 = vmatmul.mubr.msk.f32.vlgmr.msra.gmra.mrb[0].mxu0 %vm415_vm10, %v381_v3 }
  0xe0   : > { %v408_v5 = vld [vmem:[#allocation2 + $0xd0] sm:$0xff] }
  0xe1   : > { %705 = vmatpush3.msra.mxu1 %v408_v5 }
  0xe2   : > { %707 = vmatmul.mubr.msk.f32.vlgmr.msra.gmra.mrb[0].mxu1 %vm415_vm10, %v381_v3 }
  0xe9   : > { %v413_v6 = vpop.permute.xlu0 %412 }
 0x1b0   : > { %v485_v7 = vpop.f32.mrb[0].mxu0 }
 0x1b1   : > { %v486_v8 = vadd.f32 %v485_v7, %v413_v6  ;;  %v487_v9 = vpop.f32.mrb[1].mxu0 }
 0x1b2   : > { %v488_v10 = vadd.f32 %v487_v9, %v413_v6 }
 0x1b3   : > { %v560_v11 = vmax.f32 %v486_v8, 0.0 }
 0x1b4   : > { %v561_v12 = vmax.f32 %v488_v10, 0.0 }
 0x1b5   : > { %563 = vst [vmem:[%s204_s11] sm:$0xff] %v560_v11  ;;  %v556_v13 = vpop.f32.mrb[0].mxu1 }
 0x1b6   : > { %v557_v4 = vadd.f32 %v556_v13, %v413_v6  ;;  %564 = vst [vmem:[%s204_s11 + $0x8] sm:$0xff] %v561_v12  ;;  %v708_v14 = vpop.f32.mrb[1].mxu1 }
 0x1b8   : > { %v562_v15 = vmax.f32 %v557_v4, 0.0 }
 0x1ba   : > { %565 = vst.msk [vmem:[%s204_s11 + $0x10] sm:$0xff] %vm211_vm0, %v562_v15 }
 0x1bb   : > { %859 = shalt.err (!%p856_p4)
}
 0x1bc   : > { %s860_s6 = scalar_lea.hbm %s1117_s10, 384  ;;  %s864_s23 = scalar_lea.hbm %s1170_s3, 768 }
 0x1bd   : > { %p861_p6 = scmp.ne.s32.totalorder %s1117_s10, %s860_s6  ;;  %p865_p12 = scmp.lt.u32.totalorder %s1117_s10, %s1170_s3 }
 0x1be   : > { %p866_p1 = scmp.lt.u32.totalorder %s864_s23, %s860_s6  ;;  %p868_p8 = scmp.lt.u32.totalorder %s860_s6, %s1117_s10 }
 0x1bf   : > { %p862_p7 = pnand %p861_p6, %p1178_p9 }
 0x1c0   : > { %p867_p3 = por %p866_p1, %p865_p12 }
 0x1c1   : > { %p863_p10 = pneg %p862_p7 }
 0x1c2   : > { %p869_p11 = por %p868_p8, %p867_p3 }
 0x1c4   : > { %p870_p0 = pnand %p869_p11, %p863_p10 }
 0x1c6   : > { %873 = shalt.err (!%p870_p0)
}
 0x1c7   : > { %743 = dma.vmem_to_hbm [thread:$0]  (%p1178_p9), %s1119_s4, 384, %s1117_s10, %s567_s15  }
 0x1c8 PF: > { %s595_s30 = sand.u32 1, %s908_s12   ;;  %p1179_p5 = scmp.ne.s32.totalorder %s1175_s27, 0 }
 0x1c9   : > { %p1180_p13 = scmp.ge.s32.totalorder %s928_s17, 2  ;;  %s596_s5 = scalar_lea.sflag [#allocation5], %s595_s30 }
 0x1cb   : > { %p750_p2 = pnand %p1180_p13, %p1179_p5 }
 0x1cd   : > { %903 = dma.done.wait (!%p750_p2), %s596_s5, 384  }
 0x1ce   : > { %905 = vsyncadd (!%p750_p2), %s596_s5, 4294966912  ;;  %s19_s17 = sadd.s32 1, %s928_s17   ;;  %s1181_s12 = smov %s912_s13 }
 0x1cf   : > { %p16_p4 = scmp.ge.s32.totalorder %s19_s17, 4   ;;  %s1182_s13 = smov %s916_s14 }
 0x1d0   : > { %s1183_s14 = smov %s1020_s26  ;;  %s1184_s15 = smov %s924_s16 }
 0x1d1   : > { %s1185_s16 = smov %s1187_s20  ;;  %18 = sbr.rel (!%p16_p4) target bundleno = 6 (0x6), region = 77 }
 0x1d8   :  { %601 = vsyncpa [#allocation4], 1 }
 0x1d9   :  { %603 = vsyncpa [#allocation4 + $0x1], 1 }
 0x1da   :  { %604 = vsyncpa [#allocation5], 1 }
 0x1db   :  { %606 = vsyncpa [#allocation5 + $0x1], 1 }

</bundles_post_ra>
